<compile_context>
chip_gen: v7x
topology: tpu7x:2x2x1
jax: 0.10.0
libtpu: 0.0.40
codegen_flags: <defaults>
</compile_context>

<pallas_src>
import jax
import jax.numpy as jnp
from jax.experimental import pallas as pl
from jax.experimental.pallas import tpu as pltpu

LANE = 128  # padded hidden width for all intermediate layers


def _round_up(n, m):
    return ((n + m - 1) // m) * m


def channel_discriminator_kernel(x_ref, w1_ref, w2_ref, w3_ref, w4_ref, b_ref, o_ref):
    # x: (tm, 4S) f32 -> bf16.  Weights bf16, MXU accumulates in f32, biases
    # added in f32 after accumulation.
    x = x_ref[...].astype(jnp.bfloat16)                                   # (tm, 4S)
    h = jnp.dot(x, w1_ref[...], preferred_element_type=jnp.float32)      # (tm, 128)
    h = jnp.maximum(h + b_ref[0:1, :], 0.0).astype(jnp.bfloat16)
    h = jnp.dot(h, w2_ref[...], preferred_element_type=jnp.float32)
    h = jnp.maximum(h + b_ref[1:2, :], 0.0).astype(jnp.bfloat16)
    h = jnp.dot(h, w3_ref[...], preferred_element_type=jnp.float32)
    h = jnp.maximum(h + b_ref[2:3, :], 0.0).astype(jnp.bfloat16)         # (tm, 128)
    # Final 128->1 layer computed transposed so the result is a lane-dense
    # (1, tm) row: contract w4_row's feature axis against h's feature axis.
    logits = jax.lax.dot_general(
        w4_ref[...], h, (((1,), (1,)), ((), ())),
        preferred_element_type=jnp.float32)                               # (1, tm)
    logits = logits + b_ref[3:4, 0:1]                                     # f32 bias
    o_ref[...] = (1.0 / (1.0 + jnp.exp(-logits))).astype(o_ref.dtype)


def init_params(key, secret_size):
    """Synthetic nn.Linear-style init. Weights stored as (in, out) = PyTorch.T."""
    dims = [secret_size * 4, secret_size * 3, secret_size * 2, secret_size, 1]
    keys = jax.random.split(key, 8)
    params = {}
    for i in range(4):
        fan_in, fan_out = dims[i], dims[i + 1]
        bound = 1.0 / jnp.sqrt(jnp.float32(fan_in))
        params[f"w{i+1}"] = jax.random.uniform(
            keys[2 * i], (fan_in, fan_out), jnp.float32, -bound, bound)
        params[f"b{i+1}"] = jax.random.uniform(
            keys[2 * i + 1], (1, fan_out), jnp.float32, -bound, bound)
    return params


def pack_params(params, secret_size):
    """Pack weights for the kernel.

    w1: (4S, 128) bf16 (output-padded); w2, w3: (128, 128) bf16; the last
    layer is stored transposed as a (1, 128) bf16 row.  Biases are kept in a
    single (4, 128) f32 operand (row i = layer i+1 bias, zero-padded; b4 at
    [3, 0]) and added after f32 accumulation inside the kernel.
    """
    s = secret_size
    d = [4 * s, 3 * s, 2 * s, s, 1]

    w1 = jnp.zeros((d[0], LANE), jnp.float32).at[:, :d[1]].set(params["w1"])
    w2 = jnp.zeros((LANE, LANE), jnp.float32).at[:d[1], :d[2]].set(params["w2"])
    w3 = jnp.zeros((LANE, LANE), jnp.float32).at[:d[2], :d[3]].set(params["w3"])
    w4_row = jnp.zeros((1, LANE), jnp.float32).at[0, :d[3]].set(params["w4"][:, 0])

    biases = jnp.zeros((4, LANE), jnp.float32)
    biases = biases.at[0, :d[1]].set(params["b1"][0])
    biases = biases.at[1, :d[2]].set(params["b2"][0])
    biases = biases.at[2, :d[3]].set(params["b3"][0])
    biases = biases.at[3, 0].set(params["b4"][0, 0])

    return (w1.astype(jnp.bfloat16), w2.astype(jnp.bfloat16),
            w3.astype(jnp.bfloat16), w4_row.astype(jnp.bfloat16), biases)


def channel_discriminator(x, packed, *, block_m=2048):
    """x: (B, 4*S) float32. packed: output of pack_params. Returns (B, 1) f32."""
    w1, w2, w3, w4_row, biases = packed
    B, F = x.shape
    assert F == w1.shape[0], "feature dim mismatch"

    if B <= 256:
        # Single full block: every block dim equals the array dim, so there
        # are no alignment constraints and no padding anywhere.
        tm = B
    else:
        # 128-aligned batch tiles, capped near ceil(B/2) so the grid has >= 2
        # steps (lets ("parallel",) shard the batch across v7x's 2 TCs).
        tm = min(_round_up(block_m, LANE), _round_up(pl.cdiv(B, 2), LANE))
    num_tiles = pl.cdiv(B, tm)
    out_w = num_tiles * tm  # lane-dense output width (multiple of tm)

    def _resident(arr):
        # Full-array block with a constant index_map -> stays VMEM-resident.
        return pl.BlockSpec(arr.shape, lambda i: (0, 0))

    out = pl.pallas_call(
        channel_discriminator_kernel,
        out_shape=jax.ShapeDtypeStruct((1, out_w), jnp.float32),
        grid=(num_tiles,),
        in_specs=[
            pl.BlockSpec((tm, F), lambda i: (i, 0)),   # stream batch tiles
            _resident(w1), _resident(w2), _resident(w3),
            _resident(w4_row), _resident(biases),
        ],
        out_specs=pl.BlockSpec((1, tm), lambda i: (0, i)),
        compiler_params=pltpu.CompilerParams(
            dimension_semantics=("parallel",)),        # 2 TCs on v7x
    )(x, w1, w2, w3, w4_row, biases)

    # Contiguous slice of the lane-dense logit/sigmoid row -> logical (B, 1).
    return out[0, :B].reshape(B, 1)


def reference(x, params):
    h = x
    for i in range(1, 4):
        h = jnp.maximum(h @ params[f"w{i}"] + params[f"b{i}"], 0.0)
    logits = h @ params["w4"] + params["b4"]
    return 1.0 / (1.0 + jnp.exp(-logits))


if __name__ == "__main__":
    secret_size = 20
    batch = 2

    key = jax.random.PRNGKey(0)
    k_x, k_p = jax.random.split(key)
    x = jax.random.normal(k_x, (batch, secret_size * 4), jnp.float32)
    params = init_params(k_p, secret_size)
    packed = pack_params(params, secret_size)

    out = channel_discriminator(x, packed)
    out = jax.block_until_ready(out)

    ref = reference(x, params)
    assert out.shape == (batch, 1)
    # bf16 weights/activations in the kernel vs f32 reference -> loose tol
    # (biases are now added in f32 after accumulation, slightly tighter than
    # the old bf16 bias fold).
    assert jnp.allclose(out, ref, atol=2e-2, rtol=2e-2), "mismatch vs reference"

    print("KERNEL_OK")
</pallas_src>

<mosaic_0001>
module attributes {stable_mosaic.version = 11 : i64} {
  func.func @channel_discriminator_kernel(%arg0: i32, %arg1: memref<2x80xf32, #tpu.memory_space<vmem>>, %arg2: memref<80x128xbf16, #tpu.memory_space<vmem>>, %arg3: memref<128x128xbf16, #tpu.memory_space<vmem>>, %arg4: memref<128x128xbf16, #tpu.memory_space<vmem>>, %arg5: memref<1x128xbf16, #tpu.memory_space<vmem>>, %arg6: memref<4x128xf32, #tpu.memory_space<vmem>>, %arg7: memref<1x2xf32, #tpu.memory_space<vmem>>) attributes {dimension_semantics = [#tpu.dimension_semantics<parallel>], iteration_bounds = array<i64: 1>, scalar_prefetch = 0 : i64, scratch_operands = 0 : i64, tpu.core_type = #tpu.core_type<tc>, window_params = [{transform_indices = @transform_0, window_bounds = array<i64: 2, 80>}, {pipeline_mode = #tpu.pipeline_mode<synchronous>, transform_indices = @transform_1, window_bounds = array<i64: 80, 128>}, {pipeline_mode = #tpu.pipeline_mode<synchronous>, transform_indices = @transform_2, window_bounds = array<i64: 128, 128>}, {pipeline_mode = #tpu.pipeline_mode<synchronous>, transform_indices = @transform_3, window_bounds = array<i64: 128, 128>}, {pipeline_mode = #tpu.pipeline_mode<synchronous>, transform_indices = @transform_4, window_bounds = array<i64: 1, 128>}, {pipeline_mode = #tpu.pipeline_mode<synchronous>, transform_indices = @transform_5, window_bounds = array<i64: 4, 128>}, {transform_indices = @transform_6, window_bounds = array<i64: 1, 2>}]} {
    %c0 = arith.constant 0 : index
    %c0_0 = arith.constant 0 : index
    %0 = vector.load %arg1[%c0, %c0_0] : memref<2x80xf32, #tpu.memory_space<vmem>>, vector<2x80xf32>
    %1 = arith.truncf %0 : vector<2x80xf32> to vector<2x80xbf16>
    %c0_1 = arith.constant 0 : index
    %c0_2 = arith.constant 0 : index
    %2 = vector.load %arg2[%c0_1, %c0_2] : memref<80x128xbf16, #tpu.memory_space<vmem>>, vector<80x128xbf16>
    %cst = arith.constant dense<0.000000e+00> : vector<2x128xf32>
    %3 = tpu.matmul %1, %2, %cst {dimension_numbers = #tpu.dot_dimension_numbers<[1], [0], [0], [1], [0, 0, 1, 1], [], []>} : vector<2x80xbf16>, vector<80x128xbf16>, vector<2x128xf32> -> vector<2x128xf32>
    %c0_3 = arith.constant 0 : index
    %c0_4 = arith.constant 0 : index
    %4 = vector.load %arg6[%c0_3, %c0_4] : memref<4x128xf32, #tpu.memory_space<vmem>>, vector<1x128xf32>
    %5 = vector.broadcast %4 : vector<1x128xf32> to vector<2x128xf32>
    %6 = arith.addf %3, %5 : vector<2x128xf32>
    %cst_5 = arith.constant 0.000000e+00 : f32
    %7 = vector.broadcast %cst_5 : f32 to vector<2x128xf32>
    %8 = arith.maximumf %6, %7 : vector<2x128xf32>
    %9 = arith.truncf %8 : vector<2x128xf32> to vector<2x128xbf16>
    %c0_6 = arith.constant 0 : index
    %c0_7 = arith.constant 0 : index
    %10 = vector.load %arg3[%c0_6, %c0_7] : memref<128x128xbf16, #tpu.memory_space<vmem>>, vector<128x128xbf16>
    %cst_8 = arith.constant dense<0.000000e+00> : vector<2x128xf32>
    %11 = tpu.matmul %9, %10, %cst_8 {dimension_numbers = #tpu.dot_dimension_numbers<[1], [0], [0], [1], [0, 0, 1, 1], [], []>} : vector<2x128xbf16>, vector<128x128xbf16>, vector<2x128xf32> -> vector<2x128xf32>
    %c1 = arith.constant 1 : index
    %c0_9 = arith.constant 0 : index
    %12 = vector.load %arg6[%c1, %c0_9] : memref<4x128xf32, #tpu.memory_space<vmem>>, vector<1x128xf32>
    %13 = vector.broadcast %12 : vector<1x128xf32> to vector<2x128xf32>
    %14 = arith.addf %11, %13 : vector<2x128xf32>
    %cst_10 = arith.constant 0.000000e+00 : f32
    %15 = vector.broadcast %cst_10 : f32 to vector<2x128xf32>
    %16 = arith.maximumf %14, %15 : vector<2x128xf32>
    %17 = arith.truncf %16 : vector<2x128xf32> to vector<2x128xbf16>
    %c0_11 = arith.constant 0 : index
    %c0_12 = arith.constant 0 : index
    %18 = vector.load %arg4[%c0_11, %c0_12] : memref<128x128xbf16, #tpu.memory_space<vmem>>, vector<128x128xbf16>
    %cst_13 = arith.constant dense<0.000000e+00> : vector<2x128xf32>
    %19 = tpu.matmul %17, %18, %cst_13 {dimension_numbers = #tpu.dot_dimension_numbers<[1], [0], [0], [1], [0, 0, 1, 1], [], []>} : vector<2x128xbf16>, vector<128x128xbf16>, vector<2x128xf32> -> vector<2x128xf32>
    %c2 = arith.constant 2 : index
    %c0_14 = arith.constant 0 : index
    %20 = vector.load %arg6[%c2, %c0_14] : memref<4x128xf32, #tpu.memory_space<vmem>>, vector<1x128xf32>
    %21 = vector.broadcast %20 : vector<1x128xf32> to vector<2x128xf32>
    %22 = arith.addf %19, %21 : vector<2x128xf32>
    %cst_15 = arith.constant 0.000000e+00 : f32
    %23 = vector.broadcast %cst_15 : f32 to vector<2x128xf32>
    %24 = arith.maximumf %22, %23 : vector<2x128xf32>
    %25 = arith.truncf %24 : vector<2x128xf32> to vector<2x128xbf16>
    %c0_16 = arith.constant 0 : index
    %c0_17 = arith.constant 0 : index
    %26 = vector.load %arg5[%c0_16, %c0_17] : memref<1x128xbf16, #tpu.memory_space<vmem>>, vector<1x128xbf16>
    %cst_18 = arith.constant dense<0.000000e+00> : vector<1x2xf32>
    %27 = tpu.matmul %26, %25, %cst_18 {dimension_numbers = #tpu.dot_dimension_numbers<[1], [1], [0], [0], [0, 0, 1, 0], [], []>} : vector<1x128xbf16>, vector<2x128xbf16>, vector<1x2xf32> -> vector<1x2xf32>
    %c3 = arith.constant 3 : index
    %c0_19 = arith.constant 0 : index
    %28 = vector.load %arg6[%c3, %c0_19] : memref<4x128xf32, #tpu.memory_space<vmem>>, vector<1x1xf32>
    %29 = vector.broadcast %28 : vector<1x1xf32> to vector<1x2xf32>
    %30 = arith.addf %27, %29 : vector<1x2xf32>
    %cst_20 = arith.constant 0.000000e+00 : f32
    %31 = vector.broadcast %cst_20 : f32 to vector<1x2xf32>
    %32 = arith.subf %31, %30 : vector<1x2xf32>
    %33 = math.exp %32 : vector<1x2xf32>
    %cst_21 = arith.constant 1.000000e+00 : f32
    %34 = vector.broadcast %cst_21 : f32 to vector<1x2xf32>
    %35 = arith.addf %34, %33 : vector<1x2xf32>
    %cst_22 = arith.constant 1.000000e+00 : f32
    %36 = vector.broadcast %cst_22 : f32 to vector<1x2xf32>
    %37 = arith.divf %36, %35 : vector<1x2xf32>
    %c0_23 = arith.constant 0 : index
    %c0_24 = arith.constant 0 : index
    %38 = vector.load %arg7[%c0_23, %c0_24] : memref<1x2xf32, #tpu.memory_space<vmem>>, vector<1x2xf32>
    tpu.vector_store %arg7[%c0_23, %c0_24], %37 {strides = array<i32>} : memref<1x2xf32, #tpu.memory_space<vmem>>, vector<1x2xf32>,
    return
  }
  func.func @transform_0(%arg0: i32) -> (i32, i32) {
    %c0_i32 = arith.constant 0 : i32
    %c0_i32_0 = arith.constant 0 : i32
    return %arg0, %c0_i32 : i32, i32
  }
  func.func @transform_1(%arg0: i32) -> (i32, i32) {
    %c0_i32 = arith.constant 0 : i32
    %c0_i32_0 = arith.constant 0 : i32
    %c0_i32_1 = arith.constant 0 : i32
    return %c0_i32, %c0_i32_0 : i32, i32
  }
  func.func @transform_2(%arg0: i32) -> (i32, i32) {
    %c0_i32 = arith.constant 0 : i32
    %c0_i32_0 = arith.constant 0 : i32
    %c0_i32_1 = arith.constant 0 : i32
    return %c0_i32, %c0_i32_0 : i32, i32
  }
  func.func @transform_3(%arg0: i32) -> (i32, i32) {
    %c0_i32 = arith.constant 0 : i32
    %c0_i32_0 = arith.constant 0 : i32
    %c0_i32_1 = arith.constant 0 : i32
    return %c0_i32, %c0_i32_0 : i32, i32
  }
  func.func @transform_4(%arg0: i32) -> (i32, i32) {
    %c0_i32 = arith.constant 0 : i32
    %c0_i32_0 = arith.constant 0 : i32
    %c0_i32_1 = arith.constant 0 : i32
    return %c0_i32, %c0_i32_0 : i32, i32
  }
  func.func @transform_5(%arg0: i32) -> (i32, i32) {
    %c0_i32 = arith.constant 0 : i32
    %c0_i32_0 = arith.constant 0 : i32
    %c0_i32_1 = arith.constant 0 : i32
    return %c0_i32, %c0_i32_0 : i32, i32
  }
  func.func @transform_6(%arg0: i32) -> (i32, i32) {
    %c0_i32 = arith.constant 0 : i32
    %c0_i32_0 = arith.constant 0 : i32
    return %c0_i32, %arg0 : i32, i32
  }
}

</mosaic_0001>

<bundles_post_ra>
// kernel: tpu_custom_call.1
= control target key start
LH: loop header
LB: loop body
LE: loop exit
PB: predicated region body
PF: predicated region fallthrough
CT: control target
= control target key end

     0   :  { %11 = vsyncpa [#allocation3], 0  ;;  %s889_s0 = inlined_call_operand.hbm [shape: f32[2,80], index: 0, kind: input, shape index: {}]   ;;  %s890_s1 = inlined_call_operand.hbm [shape: bf16[80,128], index: 1, kind: input, shape index: {}]   ;;  %s891_s2 = inlined_call_operand.hbm [shape: bf16[128,128], index: 2, kind: input, shape index: {}]   ;;  %s892_s3 = inlined_call_operand.hbm [shape: bf16[128,128], index: 3, kind: input, shape index: {}]   ;;  %s893_s4 = inlined_call_operand.vmem [shape: bf16[1,128], index: 4, kind: input, shape index: {}]   ;;  %s894_s5 = inlined_call_operand.vmem [shape: f32[4,128], index: 5, kind: input, shape index: {}]   ;;  %s895_s6 = inlined_call_operand.hbm [shape: f32[1,2], index: 6, kind: output, shape index: {}]  }
   0x1   :  { %12 = vsyncpa [#allocation6], 0 }
   0x2   :  { %13 = vsyncpa [#allocation9], 0 }
   0x3   :  { %14 = vsyncpa [#allocation4], 0  ;;  %s730_s21 = smov [#allocation5]   ;;  %s612_s25 = scalar_lea.hbm %s890_s1, 640 }
   0x4   :  { %s30_s22 = sshll.u32 %s730_s21, 4  ;;  %p613_p0 = scmp.ne.s32.totalorder %s890_s1, %s612_s25  ;;  %s31_s22 = int_to_ptr.vmem [resolvable:$true] %s30_s22 }
   0x5   :  { %p616_p1 = scmp.lt.u32.totalorder %s612_s25, %s890_s1 }
   0x7   :  { %p618_p2 = pnand %p616_p1, %p613_p0 }
   0x9   :  { %621 = shalt.err (!%p618_p2)
}
   0xa   :  { %s622_s30 = scalar_lea.vmem %s31_s22, 640  ;;  %p627_p4 = scmp.lt.s32.totalorder %s31_s22, %s31_s22 }
   0xb   :  { %p623_p3 = scmp.ne.s32.totalorder %s31_s22, %s622_s30  ;;  %p628_p5 = scmp.lt.s32.totalorder %s622_s30, %s622_s30 }
   0xd   :  { %p629_p6 = por %p628_p5, %p627_p4 }
   0xf   :  { %p630_p7 = pnand %p629_p6, %p623_p3 }
  0x11   :  { %633 = shalt.err (!%p630_p7)
}
  0x12   :  { %s731_s7 = smov 64   ;;  %s732_s8 = smov 4  }
  0x13   :  { %36 = dma.hbm_to_vmem [thread:$0]  %s890_s1, 640, %s31_s22, [#allocation6], %s731_s7, %s731_s7, %s732_s8  }
  0x14   :  { %s733_s11 = smov [#allocation2]   ;;  %s734_s13 = smov [#allocation7]  }
  0x15   :  { %s21_s12 = sshll.u32 %s733_s11, 4  ;;  %s42_s14 = sshll.u32 %s734_s13, 4  ;;  %s22_s12 = int_to_ptr.vmem [resolvable:$true] %s21_s12  ;;  %s43_s14 = int_to_ptr.vmem [resolvable:$true] %s42_s14 }
  0x16   :  { %s634_s17 = scalar_lea.hbm %s889_s0, 32 }
  0x17   :  { %p635_p8 = scmp.ne.s32.totalorder %s889_s0, %s634_s17  ;;  %p638_p9 = scmp.lt.u32.totalorder %s634_s17, %s889_s0 }
  0x19   :  { %p640_p10 = pnand %p638_p9, %p635_p8 }
  0x1b   :  { %643 = shalt.err (!%p640_p10)
}
  0x1c   :  { %s644_s1 = scalar_lea.vmem %s22_s12, 32  ;;  %p649_p12 = scmp.lt.s32.totalorder %s22_s12, %s22_s12 }
  0x1d   :  { %p645_p11 = scmp.ne.s32.totalorder %s22_s12, %s644_s1  ;;  %p650_p13 = scmp.lt.s32.totalorder %s644_s1, %s644_s1 }
  0x1f   :  { %p651_p0 = por %p650_p13, %p649_p12 }
  0x21   :  { %p652_p1 = pnand %p651_p0, %p645_p11 }
  0x23   :  { %655 = shalt.err (!%p652_p1)
}
  0x24   :  { %24 = dma.hbm_to_vmem [thread:$0]  %s889_s0, 32, %s22_s12, [#allocation3]  }
  0x25   :  { %s656_s26 = scalar_lea.hbm %s891_s2, 1024 }
  0x26   :  { %p657_p2 = scmp.ne.s32.totalorder %s891_s2, %s656_s26  ;;  %p660_p3 = scmp.lt.u32.totalorder %s656_s26, %s891_s2 }
  0x28   :  { %p662_p4 = pnand %p660_p3, %p657_p2 }
  0x2a   :  { %665 = shalt.err (!%p662_p4)
}
  0x2b   :  { %s666_s9 = scalar_lea.vmem %s43_s14, 1024  ;;  %p671_p6 = scmp.lt.s32.totalorder %s43_s14, %s43_s14 }
  0x2c   :  { %p667_p5 = scmp.ne.s32.totalorder %s43_s14, %s666_s9  ;;  %p672_p7 = scmp.lt.s32.totalorder %s666_s9, %s666_s9 }
  0x2e   :  { %p673_p8 = por %p672_p7, %p671_p6 }
  0x30   :  { %p674_p9 = pnand %p673_p8, %p667_p5 }
  0x32   :  { %677 = shalt.err (!%p674_p9)
}
  0x33   :  { %48 = dma.hbm_to_vmem [thread:$0]  %s891_s2, 1024, %s43_s14, [#allocation6], %s731_s7, %s731_s7, %s732_s8  }
  0x34   :  { %s735_s11 = smov [#allocation8]   ;;  %s678_s16 = scalar_lea.hbm %s892_s3, 1024 }
  0x35   :  { %s54_s12 = sshll.u32 %s735_s11, 4  ;;  %p679_p10 = scmp.ne.s32.totalorder %s892_s3, %s678_s16  ;;  %s55_s12 = int_to_ptr.vmem [resolvable:$true] %s54_s12 }
  0x36   :  { %p682_p11 = scmp.lt.u32.totalorder %s678_s16, %s892_s3 }
  0x38   :  { %p684_p12 = pnand %p682_p11, %p679_p10 }
  0x3a   :  { %687 = shalt.err (!%p684_p12)
}
  0x3b   :  { %s688_s21 = scalar_lea.vmem %s55_s12, 1024  ;;  %p693_p0 = scmp.lt.s32.totalorder %s55_s12, %s55_s12 }
  0x3c   :  { %p689_p13 = scmp.ne.s32.totalorder %s55_s12, %s688_s21  ;;  %p694_p1 = scmp.lt.s32.totalorder %s688_s21, %s688_s21 }
  0x3e   :  { %p695_p2 = por %p694_p1, %p693_p0 }
  0x40   :  { %p696_p3 = pnand %p695_p2, %p689_p13 }
  0x42   :  { %699 = shalt.err (!%p696_p3)
}
  0x43   :  { %60 = dma.hbm_to_vmem [thread:$0]  %s892_s3, 1024, %s55_s12, [#allocation9], %s731_s7, %s731_s7, %s732_s8  }
  0x44   :  { %722 = dma.done.wait [#allocation3], 32  }
  0x45   :  { %723 = vsyncadd [#allocation3], 4294967264 }
  0x46   :  { %724 = dma.done.wait [#allocation6], 1664  }
  0x47   :  { %725 = vsyncadd [#allocation6], 4294965632 }
  0x48   :  { %726 = dma.done.wait [#allocation9], 1024  }
  0x49   :  { %727 = vsyncadd [#allocation9], 4294966272  ;;  %v736_v0 = vmov 0.0   ;;  %vm737_vm0 = vmmov 0   ;;  %v587_v1 = vld [vmem:[#allocation5] sm:$0xff]   ;;  %v588_v2 = vld [vmem:[#allocation5 + $0x8] sm:$0xff]  }
  0x4a   :  { %516 = vmatprep.subr.bf16.mxu0 %v736_v0  ;;  %526 = vmatprep.mubr.msk.bf16.mxu0 %vm737_vm0, %v736_v0  ;;  %v589_v3 = vld [vmem:[#allocation5 + $0x10] sm:$0xff]   ;;  %v592_v4 = vld [vmem:[#allocation7] sm:$0xff]   ;;  %v590_v6 = vld [vmem:[#allocation5 + $0x18] sm:$0xff]   ;;  %vm125_vm1 = vcmask 654336   ;;  %v738_v41 = vmov 0   ;;  %vm446_vm2 = vcmask 8192  }
  0x4b   :  { %530 = vmatprep.subr.bf16.mxu1 %v736_v0  ;;  %546 = vmatprep.mubr.msk.bf16.mxu1 %vm737_vm0, %v736_v0  ;;  %v593_v5 = vld [vmem:[#allocation7 + $0x8] sm:$0xff]   ;;  %v594_v7 = vld [vmem:[#allocation7 + $0x10] sm:$0xff]   ;;  %v591_v8 = vld [vmem:[#allocation5 + $0x20] sm:$0xff]  }
  0x4c   :  { %517 = vmatpush3.bf16.msra.mxu0 %v587_v1  ;;  %531 = vmatpush3.bf16.msra.mxu1 %v592_v4  ;;  %v78_v9 = vld [vmem:[#allocation2] sm:$0x3]  ;;  %v595_v10 = vld [vmem:[#allocation7 + $0x18] sm:$0xff]   ;;  %v596_v12 = vld [vmem:[#allocation7 + $0x20] sm:$0xff]  }
  0x4d   :  { %518 = vmatprep.subr.bf16.mxu0 %v736_v0  ;;  %532 = vmatprep.subr.bf16.mxu1 %v736_v0  ;;  %v79_v11 = vpack.c.bf16 %v78_v9, %v78_v9  ;;  %v597_v13 = vld [vmem:[#allocation7 + $0x28] sm:$0xff]   ;;  %v598_v14 = vld [vmem:[#allocation7 + $0x30] sm:$0xff]   ;;  %v599_v15 = vld [vmem:[#allocation7 + $0x38] sm:$0xff]  }
  0x4e   :  { %v600_v16 = vld [vmem:[#allocation8] sm:$0xff]   ;;  %v601_v17 = vld [vmem:[#allocation8 + $0x8] sm:$0xff]   ;;  %v602_v18 = vld [vmem:[#allocation8 + $0x10] sm:$0xff]   ;;  %586 = vset.pattern.permute.xlu0 %v738_v41 }
  0x4f   :  { %v603_v19 = vld [vmem:[#allocation8 + $0x18] sm:$0xff]   ;;  %v604_v20 = vld [vmem:[#allocation8 + $0x20] sm:$0xff]   ;;  %v605_v21 = vld [vmem:[#allocation8 + $0x28] sm:$0xff]  }
  0x50   :  { %519 = vmatpush3.bf16.msra.mxu0 %v588_v2  ;;  %533 = vmatpush3.bf16.msra.mxu1 %v593_v5  ;;  %v465_v22 = vld [vmem:[%s894_s5] ss:$0 sm:$0xff]  ;;  %v606_v30 = vld [vmem:[#allocation8 + $0x30] sm:$0xff]   ;;  %v607_v31 = vld [vmem:[#allocation8 + $0x38] sm:$0xff]  }
  0x51   :  { %520 = vmatprep.subr.bf16.mxu0 %v736_v0  ;;  %534 = vmatprep.subr.bf16.mxu1 %v736_v0  ;;  %v472_v32 = vld [vmem:[%s894_s5 + $0x1] ss:$0 sm:$0xff]  ;;  %v394_v40 = vld [vmem:[%s894_s5 + $0x3] sm:$0x1]  ;;  %v481_v42 = vld [vmem:[%s894_s5 + $0x2] ss:$0 sm:$0xff] }
  0x52   :  { %397 = vperm.xlu0 %586, %v394_v40   ;;  %v393_v50 = vld [vmem:[%s893_s4] sm:$0x1]  ;;  %s739_s5 = smov [#allocation10]  }
  0x53   :  { %s454_s28 = sshll.u32 %s739_s5, 4  ;;  %s455_s28 = int_to_ptr.vmem [resolvable:$true] %s454_s28 }
  0x54   :  { %521 = vmatpush3.bf16.msra.mxu0 %v589_v3  ;;  %535 = vmatpush3.bf16.msra.mxu1 %v594_v7  ;;  %s700_s4 = scalar_lea.vmem %s455_s28, 16  ;;  %s704_s29 = scalar_lea.vmem %s455_s28, 32 }
  0x55   :  { %522 = vmatprep.subr.bf16.mxu0 %v736_v0  ;;  %536 = vmatprep.subr.bf16.mxu1 %v736_v0  ;;  %p701_p4 = scmp.ne.s32.totalorder %s455_s28, %s700_s4  ;;  %p705_p5 = scmp.lt.s32.totalorder %s455_s28, %s455_s28 }
  0x56   :  { %p706_p6 = scmp.lt.s32.totalorder %s704_s29, %s700_s4 }
  0x58   :  { %523 = vmatpush3.bf16.msra.mxu0 %v590_v6  ;;  %537 = vmatpush3.bf16.msra.mxu1 %v595_v10  ;;  %p707_p7 = por %p706_p6, %p705_p5 }
  0x59   :  { %524 = vmatprep.subr.bf16.mxu0 %v736_v0  ;;  %538 = vmatprep.subr.bf16.mxu1 %v736_v0 }
  0x5a   :  { %p708_p8 = pnand %p707_p7, %p701_p4 }
  0x5c   :  { %525 = vmatpush3.bf16.msra.mxu0 %v591_v8  ;;  %539 = vmatpush3.bf16.msra.mxu1 %v596_v12 }
  0x5d   :  { %550 = vmatprep.subr.bf16.mxu0 %v736_v0  ;;  %540 = vmatprep.subr.bf16.mxu1 %v736_v0 }
  0x5f   :  { %527 = vmatmul.mubr.msk.bf16.vlgmr.msra.gmra.mrb[0].mxu0 %vm125_vm1, %v79_v11 }
  0x60   :  { %566 = vmatprep.mubr.msk.bf16.mxu0 %vm737_vm0, %v736_v0  ;;  %541 = vmatpush3.bf16.msra.mxu1 %v597_v13 }
  0x61   :  { %542 = vmatprep.subr.bf16.mxu1 %v736_v0  ;;  %551 = vmatpush3.bf16.msra.mxu0 %v600_v16 }
  0x62   :  { %552 = vmatprep.subr.bf16.mxu0 %v736_v0 }
  0x64   :  { %543 = vmatpush3.bf16.msra.mxu1 %v598_v14 }
  0x65   :  { %544 = vmatprep.subr.bf16.mxu1 %v736_v0  ;;  %553 = vmatpush3.bf16.msra.mxu0 %v601_v17 }
  0x66   :  { %554 = vmatprep.subr.bf16.mxu0 %v736_v0 }
  0x68   :  { %545 = vmatpush3.bf16.msra.mxu1 %v599_v15 }
  0x69   :  { %570 = vmatprep.subr.bf16.mxu1 %v736_v0  ;;  %555 = vmatpush3.bf16.msra.mxu0 %v602_v18 }
  0x6a   :  { %556 = vmatprep.subr.bf16.mxu0 %v736_v0 }
  0x6d   :  { %557 = vmatpush3.bf16.msra.mxu0 %v603_v19 }
  0x6e   :  { %558 = vmatprep.subr.bf16.mxu0 %v736_v0 }
  0x71   :  { %559 = vmatpush3.bf16.msra.mxu0 %v604_v20 }
  0x72   :  { %560 = vmatprep.subr.bf16.mxu0 %v736_v0 }
  0x75   :  { %561 = vmatpush3.bf16.msra.mxu0 %v605_v21 }
  0x76   :  { %562 = vmatprep.subr.bf16.mxu0 %v736_v0 }
  0x79   :  { %563 = vmatpush3.bf16.msra.mxu0 %v606_v30 }
  0x7a   :  { %564 = vmatprep.subr.bf16.mxu0 %v736_v0 }
  0x7d   :  { %565 = vmatpush3.bf16.msra.mxu0 %v607_v31 }
  0xd1   :  { %v398_v51 = vpop.permute.xlu0 %397 }
 0x132   :  { %v163_v23 = vpop.f32.mrb[0].mxu0 }
 0x133   :  { %v164_v24 = vadd.f32 %v465_v22, %v163_v23  ;;  %v528_v25 = vpop.f32.mrb[1].mxu0 }
 0x134   :  { %v166_v26 = vpop.f32.mrb[2].mxu0 }
 0x135   :  { %v169_v27 = vmax.f32 %v164_v24, 0.0  ;;  %v529_v28 = vpop.f32.mrb[3].mxu0 }
 0x137   :  { %v170_v29 = vpack.c.bf16 %v169_v27, %v169_v27 }
 0x139   :  { %547 = vmatmul.mubr.bf16.vlgmr.msra.gmra.mrb[0].mxu1 %v170_v29 }
 0x13a   :  { %572 = vmatprep.mubr.msk.bf16.mxu1 %vm737_vm0, %v736_v0 }
 0x20c   :  { %v274_v33 = vpop.f32.mrb[0].mxu1 }
 0x20d   :  { %v275_v34 = vadd.f32 %v472_v32, %v274_v33  ;;  %v548_v35 = vpop.f32.mrb[1].mxu1 }
 0x20e   :  { %v277_v36 = vpop.f32.mrb[2].mxu1 }
 0x20f   :  { %v280_v37 = vmax.f32 %v275_v34, 0.0  ;;  %v549_v38 = vpop.f32.mrb[3].mxu1 }
 0x211   :  { %v281_v39 = vpack.c.bf16 %v280_v37, %v280_v37 }
 0x213   :  { %567 = vmatmul.mubr.bf16.vlgmr.msra.gmra.mrb[4].mxu0 %v281_v39 }
 0x2e6   :  { %v385_v43 = vpop.f32.mrb[4].mxu0 }
 0x2e7   :  { %v386_v44 = vadd.f32 %v481_v42, %v385_v43  ;;  %v568_v45 = vpop.f32.mrb[5].mxu0 }
 0x2e8   :  { %v388_v46 = vpop.f32.mrb[6].mxu0 }
 0x2e9   :  { %v391_v47 = vmax.f32 %v386_v44, 0.0  ;;  %v569_v48 = vpop.f32.mrb[7].mxu0 }
 0x2eb   :  { %v392_v49 = vpack.c.bf16 %v391_v47, %v391_v47 }
 0x2ed   :  { %571 = vmatpush3.bf16.xpose.msra.mxu1 %v392_v49 }
 0x2f4   :  { %573 = vmatmul.mubr.bf16.vlgmr.msra.gmra.mrb[4].mxu1 %v393_v50 }
 0x3c7   :  { %v434_v52 = vpop.f32.mrb[4].mxu1 }
 0x3c8   :  { %v435_v53 = vadd.f32 %v434_v52, %v398_v51  ;;  %v574_v54 = vpop.f32.mrb[5].mxu1 }
 0x3c9   :  { %v437_v55 = vpop.f32.mrb[6].mxu1 }
 0x3ca   :  { %v440_v56 = vsub.f32 0.0, %v435_v53  ;;  %v575_v57 = vpop.f32.mrb[7].mxu1 }
 0x3cc   :  { %v441_v58 = vmul.f32 1.442695, %v440_v56 }
 0x3ce   :  { %608 = vpow2.f32 %v441_v58 }
 0x3d8   :  { %v609_v59 = vpop.eup %608 }
 0x3d9   :  { %v443_v60 = vadd.f32 1.0, %v609_v59 }
 0x3db   :  { %610 = vrcp.f32 %v443_v60 }
 0x3e5   :  { %v611_v61 = vpop.eup %610 }
 0x3e6   :  { %447 = vst.msk [vmem:[#allocation10] sm:$0x1] %vm446_vm2, %v611_v61 }
 0x3e7   :  { %711 = shalt.err (!%p708_p8)
}
 0x3e8   :  { %s712_s0 = scalar_lea.hbm %s895_s6, 16 }
 0x3e9   :  { %p713_p9 = scmp.ne.s32.totalorder %s895_s6, %s712_s0  ;;  %p716_p10 = scmp.lt.u32.totalorder %s712_s0, %s895_s6 }
 0x3eb   :  { %p718_p11 = pnand %p716_p10, %p713_p9 }
 0x3ed   :  { %721 = shalt.err (!%p718_p11)
}
 0x3ee   :  { %457 = dma.vmem_to_hbm [thread:$0]  %s455_s28, 16, %s895_s6, [#allocation4]  }
 0x3ef   :  { %728 = dma.done.wait [#allocation4], 16  }
 0x3f0   :  { %729 = vsyncadd [#allocation4], 4294967280 }
 0x3f1   :  { %461 = vsyncpa [#allocation3], 1 }
 0x3f2   :  { %462 = vsyncpa [#allocation6], 1 }
 0x3f3   :  { %463 = vsyncpa [#allocation9], 1 }
 0x3f4   :  { %464 = vsyncpa [#allocation4], 1 }

</bundles_post_ra>
